<compile_context>
chip_gen: v7x
topology: tpu7x:2x2x1
jax: 0.10.0
libtpu: 0.0.40
codegen_flags: <defaults>
</compile_context>

<pallas_src>
import math
from functools import partial

import numpy as np
import jax
import jax.numpy as jnp
from jax.experimental import pallas as pl
from jax.experimental.pallas import tpu as pltpu


# ----------------------------------------------------------------------------
# Host-side construction of the (linear) Radon / filter / backprojection ops.
# TODO(synk): the external Radon/IRadon classes are not provided; standard
# parallel-beam rotate+sum Radon and Kak-Slaney ramp-filtered backprojection
# are materialised as dense linear operators instead.
# ----------------------------------------------------------------------------
def build_theta_fs(theta_deg, us_factor):
    """Fine-angle grid + measured-angle mask (index based, no float isin)."""
    theta_fs = []
    for i in range(len(theta_deg) - 1):
        seg = np.linspace(theta_deg[i], theta_deg[i + 1], us_factor + 1)[:-1]
        theta_fs.extend(seg.tolist())
    theta_fs.append(float(theta_deg[-1]))
    theta_fs = np.asarray(theta_fs, dtype=np.float64)
    mask = np.zeros(len(theta_fs), dtype=bool)
    mask[np.arange(len(theta_deg)) * us_factor] = True   # measured angles
    return theta_fs, mask


def build_radon_matrix(H, W, D, thetas_rad):
    """Forward parallel-beam projection matrix, shape (A*D, H*W)."""
    A = len(thetas_rad)
    cd = (D - 1) / 2.0
    ci = (H - 1) / 2.0
    cj = (W - 1) / 2.0
    dgrid = np.arange(D) - cd
    tgrid = np.arange(D) - cd
    R = np.zeros((A, D, H, W), dtype=np.float64)
    for a, th in enumerate(thetas_rad):
        c, s = math.cos(th), math.sin(th)
        x = dgrid[:, None] * c - tgrid[None, :] * s + cj
        y = dgrid[:, None] * s + tgrid[None, :] * c + ci
        x0 = np.floor(x).astype(np.int64)
        y0 = np.floor(y).astype(np.int64)
        wx = x - x0
        wy = y - y0
        for dy, dx, w in ((0, 0, (1 - wy) * (1 - wx)),
                          (0, 1, (1 - wy) * wx),
                          (1, 0, wy * (1 - wx)),
                          (1, 1, wy * wx)):
            yy = y0 + dy
            xx = x0 + dx
            valid = (yy >= 0) & (yy < H) & (xx >= 0) & (xx < W)
            det_idx, _ = np.nonzero(valid)
            np.add.at(R[a], (det_idx, yy[valid], xx[valid]), w[valid])
    return R.reshape(A * D, H * W)


def build_ramp_filter_matrix(D):
    """Kak-Slaney spatial-domain ramp filter as a (D, D) convolution matrix."""
    n = np.arange(-(D - 1), D)
    h = np.zeros_like(n, dtype=np.float64)
    h[n == 0] = 0.25
    odd = (n % 2) != 0
    h[odd] = -1.0 / (np.pi * n[odd]) ** 2
    F = np.zeros((D, D), dtype=np.float64)
    for i in range(D):
        for j in range(D):
            F[i, j] = h[(i - j) + (D - 1)]
    return F


def build_backproj_matrix(H, W, D, thetas_rad):
    """Backprojection matrix, shape (H*W, A, D), bilinear along detector."""
    A = len(thetas_rad)
    cd = (D - 1) / 2.0
    ci = (H - 1) / 2.0
    cj = (W - 1) / 2.0
    ii, jj = np.meshgrid(np.arange(H), np.arange(W), indexing="ij")
    xc = (jj - cj).ravel()
    yc = (ii - ci).ravel()
    BP = np.zeros((H * W, A, D), dtype=np.float64)
    for a, th in enumerate(thetas_rad):
        p = xc * math.cos(th) + yc * math.sin(th) + cd
        p0 = np.floor(p).astype(np.int64)
        wp = p - p0
        for off, w in ((0, 1.0 - wp), (1, wp)):
            pp = p0 + off
            valid = (pp >= 0) & (pp < D)
            idx = np.nonzero(valid)[0]
            np.add.at(BP, (idx, np.full_like(idx, a), pp[valid]), w[valid])
    BP *= np.pi / A
    return BP


# ----------------------------------------------------------------------------
# Padding / tiling helpers (generation aware).
# ----------------------------------------------------------------------------
def _round_up(n, m):
    return (n + m - 1) // m * m


def _largest_tile_divisor(total, max_tile):
    """Largest multiple of 128 that divides `total` and is <= max_tile."""
    best = 128
    t = 128
    limit = min(total, max(max_tile, 128))
    while t <= limit:
        if total % t == 0:
            best = t
        t += 128
    return best


def plan_tiles(HW, AD):
    """Pick hw_tile / ad_tile / VMEM limit based on the TPU generation.

    The dominant per-stream VMEM cost is the double-buffered bf16 operator
    panel (hw_tile x ad_tile): 2 bufs * 2 bytes = 4 * hw_tile * ad_tile bytes.
    """
    HW_pad = _round_up(HW, 128)
    AD_pad = _round_up(AD, 128)
    try:
        vmem_cap = int(pltpu.get_tpu_info().vmem_capacity_bytes)
    except Exception:
        vmem_cap = 64 << 20   # conservative fallback
    if vmem_cap >= (100 << 20):            # v5e / v6e: 128 MiB physical VMEM
        vmem_limit = 100 << 20
        panel_budget = 40 << 20
        max_hw_tile, max_ad_tile = 4096, 1024
    else:                                  # v7x: 64 MiB physical / 32 scoped
        vmem_limit = 32 << 20
        panel_budget = 12 << 20
        max_hw_tile, max_ad_tile = 2048, 512
    ad_tile = _largest_tile_divisor(AD_pad, max_ad_tile)
    hw_cap = max(128, (panel_budget // (4 * ad_tile)) // 128 * 128)
    hw_tile = _largest_tile_divisor(HW_pad, min(max_hw_tile, hw_cap))
    return HW_pad, AD_pad, hw_tile, ad_tile, vmem_limit


def prepare_operators(R, BPF, mask_angles, D):
    """Fold the DC blend into Radon, pad to TPU-dense shapes, cast to bf16.

    R:   (A*D, H*W)  forward projection
    BPF: (H*W, A*D)  ramp-filtered backprojection
    Returns RT_scaled (HW_pad, AD_pad) bf16 and BPFT (AD_pad, HW_pad) bf16.
    Zero padding is numerically inert (pad rows/cols multiply zeros only).
    """
    AD, HW = R.shape
    AD_pad = _round_up(AD, 128)
    HW_pad = _round_up(HW, 128)
    sign = 1.0 - 2.0 * np.repeat(mask_angles.astype(np.float64), D)   # (A*D,)
    rt = np.zeros((HW_pad, AD_pad), np.float32)
    rt[:HW, :AD] = (R.T * sign[None, :]).astype(np.float32)           # DC fold
    bpft = np.zeros((AD_pad, HW_pad), np.float32)
    bpft[:AD, :HW] = BPF.T.astype(np.float32)
    return jnp.asarray(rt, jnp.bfloat16), jnp.asarray(bpft, jnp.bfloat16)


# ----------------------------------------------------------------------------
# Pallas kernels.
# ----------------------------------------------------------------------------
def radon_dc_kernel(x_ref, rt_ref, st_ref, s_ref, acc_ref):
    # Stage 1: s_dc = st_masked + x @ RT_scaled.
    # Grid (n_ad parallel, n_hw arbitrary); HW is the reduction axis; the f32
    # accumulator scratch is initialised from the masked target and the bf16
    # output block is written once on the last reduction step.
    k = pl.program_id(1)

    @pl.when(k == 0)
    def _():
        acc_ref[...] = st_ref[...]

    acc_ref[...] += jnp.dot(x_ref[...], rt_ref[...],
                            preferred_element_type=jnp.float32)

    @pl.when(k == pl.num_programs(1) - 1)
    def _():
        s_ref[...] = acc_ref[...].astype(s_ref.dtype)


def fbp_kernel(s_ref, bpft_ref, y_ref, acc_ref):
    # Stage 2: y = s_dc @ BPFT.
    # Grid (n_hw parallel, n_ad arbitrary); AD is the reduction axis.
    k = pl.program_id(1)

    @pl.when(k == 0)
    def _():
        acc_ref[...] = jnp.zeros_like(acc_ref)

    acc_ref[...] += jnp.dot(s_ref[...], bpft_ref[...],
                            preferred_element_type=jnp.float32)

    @pl.when(k == pl.num_programs(1) - 1)
    def _():
        y_ref[...] = acc_ref[...]


# ----------------------------------------------------------------------------
# Wrapper.
# ----------------------------------------------------------------------------
def _pad_inputs(x_source, s_target, meas_idx, A, D, BC_pad, HW_pad, AD_pad):
    B, C, H, W = x_source.shape
    BC, HW = B * C, H * W
    AD = A * D
    x = x_source.reshape(BC, HW).astype(jnp.bfloat16)
    x = jnp.pad(x, ((0, BC_pad - BC), (0, HW_pad - HW)))
    n_meas = s_target.shape[-1]
    st = s_target.reshape(BC, D, n_meas).astype(jnp.float32)
    st_full = jnp.zeros((BC, A, D), jnp.float32)
    st_full = st_full.at[:, meas_idx, :].set(jnp.transpose(st, (0, 2, 1)))
    st_flat = jnp.pad(st_full.reshape(BC, AD),
                      ((0, BC_pad - BC), (0, AD_pad - AD)))
    return x, st_flat


@partial(jax.jit,
         static_argnames=("A", "D", "hw_tile", "ad_tile", "vmem_limit"))
def data_consistency_sinogram(x_source, s_target, rt_scaled, bpft, meas_idx,
                              A, D, hw_tile, ad_tile, vmem_limit):
    B, C, H, W = x_source.shape
    BC, HW = B * C, H * W
    HW_pad, AD_pad = rt_scaled.shape
    # Tiling consistency checks (trace-time, shapes are static).
    assert bpft.shape == (AD_pad, HW_pad), (bpft.shape, rt_scaled.shape)
    assert HW_pad % hw_tile == 0, (HW_pad, hw_tile)
    assert AD_pad % ad_tile == 0, (AD_pad, ad_tile)
    assert HW_pad >= HW and AD_pad >= A * D
    # bf16 LHS min tile is (16, 128): keep the batch axis sublane-dense.
    # Caller-side batching (more images/slices per call) raises MXU M further.
    BC_pad = _round_up(max(BC, 16), 16)
    n_hw = HW_pad // hw_tile
    n_ad = AD_pad // ad_tile

    x_pad, st_flat = _pad_inputs(x_source, s_target, meas_idx, A, D,
                                 BC_pad, HW_pad, AD_pad)

    # Stage 1: forward projection + folded data consistency.
    s_dc = pl.pallas_call(
        radon_dc_kernel,
        out_shape=jax.ShapeDtypeStruct((BC_pad, AD_pad), jnp.bfloat16),
        grid_spec=pltpu.PrefetchScalarGridSpec(
            num_scalar_prefetch=0,
            grid=(n_ad, n_hw),
            in_specs=[pl.BlockSpec((BC_pad, hw_tile), lambda i, k: (0, k)),
                      pl.BlockSpec((hw_tile, ad_tile), lambda i, k: (k, i)),
                      pl.BlockSpec((BC_pad, ad_tile), lambda i, k: (0, i))],
            out_specs=pl.BlockSpec((BC_pad, ad_tile), lambda i, k: (0, i)),
            scratch_shapes=[pltpu.VMEM((BC_pad, ad_tile), jnp.float32)]),
        compiler_params=pltpu.CompilerParams(
            dimension_semantics=("parallel", "arbitrary"),
            vmem_limit_bytes=vmem_limit),
        cost_estimate=pl.CostEstimate(
            flops=int(2 * BC_pad * HW_pad * AD_pad),
            transcendentals=0,
            bytes_accessed=int(n_ad * BC_pad * HW_pad * 2
                               + HW_pad * AD_pad * 2
                               + BC_pad * AD_pad * (4 + 2))),
    )(x_pad, rt_scaled, st_flat)

    # Stage 2: ramp-filtered backprojection (parallel over output HW tiles).
    y_pad = pl.pallas_call(
        fbp_kernel,
        out_shape=jax.ShapeDtypeStruct((BC_pad, HW_pad), jnp.float32),
        grid_spec=pltpu.PrefetchScalarGridSpec(
            num_scalar_prefetch=0,
            grid=(n_hw, n_ad),
            in_specs=[pl.BlockSpec((BC_pad, ad_tile), lambda j, k: (0, k)),
                      pl.BlockSpec((ad_tile, hw_tile), lambda j, k: (k, j))],
            out_specs=pl.BlockSpec((BC_pad, hw_tile), lambda j, k: (0, j)),
            scratch_shapes=[pltpu.VMEM((BC_pad, hw_tile), jnp.float32)]),
        compiler_params=pltpu.CompilerParams(
            dimension_semantics=("parallel", "arbitrary"),
            vmem_limit_bytes=vmem_limit),
        cost_estimate=pl.CostEstimate(
            flops=int(2 * BC_pad * AD_pad * HW_pad),
            transcendentals=0,
            bytes_accessed=int(AD_pad * HW_pad * 2
                               + n_hw * BC_pad * AD_pad * 2
                               + BC_pad * HW_pad * 4)),
    )(s_dc, bpft)

    return y_pad[:BC, :HW].reshape(B, C, H, W)


if __name__ == "__main__":
    # Small, module-consistent shapes: image_size=16, 5 measured angles,
    # us_factor=2 -> 9 fine angles, det_count = int(16*sqrt(2)+0.5) = 23.
    B, C, H = 2, 1, 16
    W = H
    us_factor = 2
    theta_deg = np.array([0.0, 45.0, 90.0, 135.0, 180.0])   # measured angles
    D = int(H * 2 ** 0.5 + 0.5)

    theta_fs_deg, mask = build_theta_fs(theta_deg, us_factor)
    A = len(theta_fs_deg)
    thetas_rad = theta_fs_deg * np.pi / 180.0
    meas_idx = np.nonzero(mask)[0]

    # Deterministic dense linear operators standing in for Radon / IRadon.
    R = build_radon_matrix(H, W, D, thetas_rad)                    # (A*D, HW)
    F = build_ramp_filter_matrix(D)                                # (D, D)
    BP = build_backproj_matrix(H, W, D, thetas_rad)                # (HW, A, D)
    BPF = np.einsum("pad,de->pae", BP, F).reshape(H * W, A * D)    # (HW, A*D)

    HW_pad, AD_pad, hw_tile, ad_tile, vmem_limit = plan_tiles(H * W, A * D)
    rt_scaled, bpft = prepare_operators(R, BPF, mask, D)
    assert rt_scaled.shape == (HW_pad, AD_pad)
    assert bpft.shape == (AD_pad, HW_pad)
    meas_idx_j = jnp.asarray(meas_idx, jnp.int32)

    key = jax.random.PRNGKey(0)
    k1, k2 = jax.random.split(key)
    x_source = jax.random.normal(k1, (B, C, H, W), jnp.float32)
    s_target = jax.random.normal(k2, (B, C, D, len(theta_deg)), jnp.float32)

    y = data_consistency_sinogram(x_source, s_target, rt_scaled, bpft,
                                  meas_idx_j, A, D, hw_tile, ad_tile,
                                  vmem_limit)
    jax.block_until_ready(y)
    assert y.shape == (B, C, H, W)
    assert bool(jnp.isfinite(y).all())

    # Pure-JAX reference of the same (bf16-operand, bf16 s_dc) linear algebra.
    BC_pad = _round_up(max(B * C, 16), 16)
    x_pad, st_flat = _pad_inputs(x_source, s_target, meas_idx_j, A, D,
                                 BC_pad, HW_pad, AD_pad)
    s_ref = st_flat + jnp.dot(x_pad.astype(jnp.float32),
                              rt_scaled.astype(jnp.float32))
    y_ref = jnp.dot(s_ref.astype(jnp.bfloat16).astype(jnp.float32),
                    bpft.astype(jnp.float32))
    y_ref = y_ref[:B * C, :H * W].reshape(B, C, H, W)
    err = float(jnp.max(jnp.abs(y - y_ref)))
    scale = float(jnp.max(jnp.abs(y_ref))) + 1e-6
    assert err <= max(5e-3 * scale, 1e-4), (err, scale)

    print("KERNEL_OK")
</pallas_src>

<mosaic_0001>
module attributes {stable_mosaic.version = 11 : i64} {
  func.func @fbp_kernel(%arg0: i32, %arg1: i32, %arg2: memref<16x256xbf16, #tpu.memory_space<vmem>>, %arg3: memref<256x256xbf16, #tpu.memory_space<vmem>>, %arg4: memref<16x256xf32, #tpu.memory_space<vmem>>, %arg5: memref<16x256xf32, #tpu.memory_space<vmem>>) attributes {dimension_semantics = [#tpu.dimension_semantics<parallel>, #tpu.dimension_semantics<arbitrary>], iteration_bounds = array<i64: 1, 1>, scalar_prefetch = 0 : i64, scratch_operands = 1 : i64, tpu.core_type = #tpu.core_type<tc>, window_params = [{transform_indices = @transform_0, window_bounds = array<i64: 16, 256>}, {transform_indices = @transform_1, window_bounds = array<i64: 256, 256>}, {transform_indices = @transform_2, window_bounds = array<i64: 16, 256>}]} {
    %c0_i32 = arith.constant 0 : i32
    %0 = arith.cmpi eq, %arg1, %c0_i32 : i32
    %1 = arith.extui %0 : i1 to i32
    %c0_i32_0 = arith.constant 0 : i32
    %2 = arith.cmpi ne, %1, %c0_i32_0 : i32
    scf.if %2 {
      %cst_10 = arith.constant 0.000000e+00 : f32
      %12 = vector.broadcast %cst_10 : f32 to vector<16x256xf32>
      %c0_11 = arith.constant 0 : index
      %c0_12 = arith.constant 0 : index
      %13 = vector.load %arg5[%c0_11, %c0_12] : memref<16x256xf32, #tpu.memory_space<vmem>>, vector<16x256xf32>
      tpu.vector_store %arg5[%c0_11, %c0_12], %12 {strides = array<i32>} : memref<16x256xf32, #tpu.memory_space<vmem>>, vector<16x256xf32>,
    } else {
    }
    %c0 = arith.constant 0 : index
    %c0_1 = arith.constant 0 : index
    %3 = vector.load %arg5[%c0, %c0_1] : memref<16x256xf32, #tpu.memory_space<vmem>>, vector<16x256xf32>
    %c0_2 = arith.constant 0 : index
    %c0_3 = arith.constant 0 : index
    %4 = vector.load %arg2[%c0_2, %c0_3] : memref<16x256xbf16, #tpu.memory_space<vmem>>, vector<16x256xbf16>
    %c0_4 = arith.constant 0 : index
    %c0_5 = arith.constant 0 : index
    %5 = vector.load %arg3[%c0_4, %c0_5] : memref<256x256xbf16, #tpu.memory_space<vmem>>, vector<256x256xbf16>
    %cst = arith.constant dense<0.000000e+00> : vector<16x256xf32>
    %6 = tpu.matmul %4, %5, %cst {dimension_numbers = #tpu.dot_dimension_numbers<[1], [0], [0], [1], [0, 0, 1, 1], [], []>} : vector<16x256xbf16>, vector<256x256xbf16>, vector<16x256xf32> -> vector<16x256xf32>
    %7 = arith.addf %3, %6 : vector<16x256xf32>
    %c0_6 = arith.constant 0 : index
    %c0_7 = arith.constant 0 : index
    %8 = vector.load %arg5[%c0_6, %c0_7] : memref<16x256xf32, #tpu.memory_space<vmem>>, vector<16x256xf32>
    tpu.vector_store %arg5[%c0_6, %c0_7], %7 {strides = array<i32>} : memref<16x256xf32, #tpu.memory_space<vmem>>, vector<16x256xf32>,
    %c0_i32_8 = arith.constant 0 : i32
    %9 = arith.cmpi eq, %arg1, %c0_i32_8 : i32
    %10 = arith.extui %9 : i1 to i32
    %c0_i32_9 = arith.constant 0 : i32
    %11 = arith.cmpi ne, %10, %c0_i32_9 : i32
    scf.if %11 {
      %c0_10 = arith.constant 0 : index
      %c0_11 = arith.constant 0 : index
      %12 = vector.load %arg5[%c0_10, %c0_11] : memref<16x256xf32, #tpu.memory_space<vmem>>, vector<16x256xf32>
      %c0_12 = arith.constant 0 : index
      %c0_13 = arith.constant 0 : index
      %13 = vector.load %arg4[%c0_12, %c0_13] : memref<16x256xf32, #tpu.memory_space<vmem>>, vector<16x256xf32>
      tpu.vector_store %arg4[%c0_12, %c0_13], %12 {strides = array<i32>} : memref<16x256xf32, #tpu.memory_space<vmem>>, vector<16x256xf32>,
    } else {
    }
    return
  }
  func.func @transform_0(%arg0: i32, %arg1: i32) -> (i32, i32) {
    %c0_i32 = arith.constant 0 : i32
    %c0_i32_0 = arith.constant 0 : i32
    return %c0_i32, %arg1 : i32, i32
  }
  func.func @transform_1(%arg0: i32, %arg1: i32) -> (i32, i32) {
    %c0_i32 = arith.constant 0 : i32
    return %arg1, %arg0 : i32, i32
  }
  func.func @transform_2(%arg0: i32, %arg1: i32) -> (i32, i32) {
    %c0_i32 = arith.constant 0 : i32
    %c0_i32_0 = arith.constant 0 : i32
    return %c0_i32, %arg0 : i32, i32
  }
}

module attributes {stable_mosaic.version = 11 : i64} {
  func.func @radon_dc_kernel(%arg0: i32, %arg1: i32, %arg2: memref<16x256xbf16, #tpu.memory_space<vmem>>, %arg3: memref<256x256xbf16, #tpu.memory_space<vmem>>, %arg4: memref<16x256xf32, #tpu.memory_space<vmem>>, %arg5: memref<16x256xbf16, #tpu.memory_space<vmem>>, %arg6: memref<16x256xf32, #tpu.memory_space<vmem>>) attributes {dimension_semantics = [#tpu.dimension_semantics<parallel>, #tpu.dimension_semantics<arbitrary>], iteration_bounds = array<i64: 1, 1>, scalar_prefetch = 0 : i64, scratch_operands = 1 : i64, tpu.core_type = #tpu.core_type<tc>, window_params = [{transform_indices = @transform_0, window_bounds = array<i64: 16, 256>}, {transform_indices = @transform_1, window_bounds = array<i64: 256, 256>}, {transform_indices = @transform_2, window_bounds = array<i64: 16, 256>}, {transform_indices = @transform_3, window_bounds = array<i64: 16, 256>}]} {
    %c0_i32 = arith.constant 0 : i32
    %0 = arith.cmpi eq, %arg1, %c0_i32 : i32
    %1 = arith.extui %0 : i1 to i32
    %c0_i32_0 = arith.constant 0 : i32
    %2 = arith.cmpi ne, %1, %c0_i32_0 : i32
    scf.if %2 {
      %c0_10 = arith.constant 0 : index
      %c0_11 = arith.constant 0 : index
      %12 = vector.load %arg4[%c0_10, %c0_11] : memref<16x256xf32, #tpu.memory_space<vmem>>, vector<16x256xf32>
      %c0_12 = arith.constant 0 : index
      %c0_13 = arith.constant 0 : index
      %13 = vector.load %arg6[%c0_12, %c0_13] : memref<16x256xf32, #tpu.memory_space<vmem>>, vector<16x256xf32>
      tpu.vector_store %arg6[%c0_12, %c0_13], %12 {strides = array<i32>} : memref<16x256xf32, #tpu.memory_space<vmem>>, vector<16x256xf32>,
    } else {
    }
    %c0 = arith.constant 0 : index
    %c0_1 = arith.constant 0 : index
    %3 = vector.load %arg6[%c0, %c0_1] : memref<16x256xf32, #tpu.memory_space<vmem>>, vector<16x256xf32>
    %c0_2 = arith.constant 0 : index
    %c0_3 = arith.constant 0 : index
    %4 = vector.load %arg2[%c0_2, %c0_3] : memref<16x256xbf16, #tpu.memory_space<vmem>>, vector<16x256xbf16>
    %c0_4 = arith.constant 0 : index
    %c0_5 = arith.constant 0 : index
    %5 = vector.load %arg3[%c0_4, %c0_5] : memref<256x256xbf16, #tpu.memory_space<vmem>>, vector<256x256xbf16>
    %cst = arith.constant dense<0.000000e+00> : vector<16x256xf32>
    %6 = tpu.matmul %4, %5, %cst {dimension_numbers = #tpu.dot_dimension_numbers<[1], [0], [0], [1], [0, 0, 1, 1], [], []>} : vector<16x256xbf16>, vector<256x256xbf16>, vector<16x256xf32> -> vector<16x256xf32>
    %7 = arith.addf %3, %6 : vector<16x256xf32>
    %c0_6 = arith.constant 0 : index
    %c0_7 = arith.constant 0 : index
    %8 = vector.load %arg6[%c0_6, %c0_7] : memref<16x256xf32, #tpu.memory_space<vmem>>, vector<16x256xf32>
    tpu.vector_store %arg6[%c0_6, %c0_7], %7 {strides = array<i32>} : memref<16x256xf32, #tpu.memory_space<vmem>>, vector<16x256xf32>,
    %c0_i32_8 = arith.constant 0 : i32
    %9 = arith.cmpi eq, %arg1, %c0_i32_8 : i32
    %10 = arith.extui %9 : i1 to i32
    %c0_i32_9 = arith.constant 0 : i32
    %11 = arith.cmpi ne, %10, %c0_i32_9 : i32
    scf.if %11 {
      %c0_10 = arith.constant 0 : index
      %c0_11 = arith.constant 0 : index
      %12 = vector.load %arg6[%c0_10, %c0_11] : memref<16x256xf32, #tpu.memory_space<vmem>>, vector<16x256xf32>
      %13 = arith.truncf %12 : vector<16x256xf32> to vector<16x256xbf16>
      %c0_12 = arith.constant 0 : index
      %c0_13 = arith.constant 0 : index
      %14 = vector.load %arg5[%c0_12, %c0_13] : memref<16x256xbf16, #tpu.memory_space<vmem>>, vector<16x256xbf16>
      tpu.vector_store %arg5[%c0_12, %c0_13], %13 {strides = array<i32>} : memref<16x256xbf16, #tpu.memory_space<vmem>>, vector<16x256xbf16>,
    } else {
    }
    return
  }
  func.func @transform_0(%arg0: i32, %arg1: i32) -> (i32, i32) {
    %c0_i32 = arith.constant 0 : i32
    %c0_i32_0 = arith.constant 0 : i32
    return %c0_i32, %arg1 : i32, i32
  }
  func.func @transform_1(%arg0: i32, %arg1: i32) -> (i32, i32) {
    %c0_i32 = arith.constant 0 : i32
    return %arg1, %arg0 : i32, i32
  }
  func.func @transform_2(%arg0: i32, %arg1: i32) -> (i32, i32) {
    %c0_i32 = arith.constant 0 : i32
    %c0_i32_0 = arith.constant 0 : i32
    return %c0_i32, %arg0 : i32, i32
  }
  func.func @transform_3(%arg0: i32, %arg1: i32) -> (i32, i32) {
    %c0_i32 = arith.constant 0 : i32
    %c0_i32_0 = arith.constant 0 : i32
    return %c0_i32, %arg0 : i32, i32
  }
}

</mosaic_0001>

<bundles_post_ra>
// kernel: data_consistency_sinogram.2
= control target key start
LH: loop header
LB: loop body
LE: loop exit
PB: predicated region body
PF: predicated region fallthrough
CT: control target
= control target key end

     0   :  { %s539_s1 = inlined_call_operand.vmem [shape: bf16[256,256], index: 1, kind: input, shape index: {}]   ;;  %s540_s0 = inlined_call_operand.vmem [shape: bf16[16,256], index: 0, kind: input, shape index: {}]   ;;  %s541_s2 = inlined_call_operand.vmem [shape: f32[16,256], index: 2, kind: input, shape index: {}]   ;;  %s542_s3 = inlined_call_operand.vmem [shape: bf16[16,256], index: 3, kind: output, shape index: {}]  }
   0x1   :  { %v348_v0 = vld [vmem:[%s539_s1 + $0x4] ss:$8 sps:$4 sm:$0xff]   ;;  %v350_v1 = vld [vmem:[%s539_s1] ss:$8 sps:$4 sm:$0xff]   ;;  %v351_v2 = vld [vmem:[%s539_s1 + $0x14] ss:$8 sps:$4 sm:$0xff]  }
   0x2   :  { %234 = vmatprep.subr.bf16.mxu0 %v348_v0  ;;  %v353_v3 = vld [vmem:[%s539_s1 + $0x10] ss:$8 sps:$4 sm:$0xff]   ;;  %v354_v4 = vld [vmem:[%s539_s1 + $0x24] ss:$8 sps:$4 sm:$0xff]   ;;  %v356_v5 = vld [vmem:[%s539_s1 + $0x20] ss:$8 sps:$4 sm:$0xff]  }
   0x3   :  { %235 = vmatpush1.bf16.msra.mxu0 %v350_v1  ;;  %v357_v6 = vld [vmem:[%s539_s1 + $0x34] ss:$8 sps:$4 sm:$0xff]   ;;  %v359_v7 = vld [vmem:[%s539_s1 + $0x30] ss:$8 sps:$4 sm:$0xff]   ;;  %v360_v8 = vld [vmem:[%s539_s1 + $0x44] ss:$8 sps:$4 sm:$0xff]  }
   0x4   :  { %236 = vmatprep.subr.bf16.mxu0 %v351_v2  ;;  %v362_v9 = vld [vmem:[%s539_s1 + $0x40] ss:$8 sps:$4 sm:$0xff]   ;;  %v363_v10 = vld [vmem:[%s539_s1 + $0x54] ss:$8 sps:$4 sm:$0xff]   ;;  %v365_v11 = vld [vmem:[%s539_s1 + $0x50] ss:$8 sps:$4 sm:$0xff]  }
   0x5   :  { %v366_v12 = vld [vmem:[%s539_s1 + $0x64] ss:$8 sps:$4 sm:$0xff]   ;;  %v368_v14 = vld [vmem:[%s539_s1 + $0x60] ss:$8 sps:$4 sm:$0xff]   ;;  %v369_v15 = vld [vmem:[%s539_s1 + $0x74] ss:$8 sps:$4 sm:$0xff]  }
   0x6   :  { %v398_v13 = vld [vmem:[%s540_s0 + $0x4] ss:$8 sps:$4 sm:$0xff]   ;;  %v371_v16 = vld [vmem:[%s539_s1 + $0x70] ss:$8 sps:$4 sm:$0xff]   ;;  %v374_v18 = vld [vmem:[%s539_s1 + $0x80] ss:$8 sps:$4 sm:$0xff]  }
   0x7   :  { %237 = vmatpush1.bf16.msra.mxu0 %v353_v3  ;;  %266 = vmatprep.mubr.bf16.mxu0 %v398_v13  ;;  %v372_v17 = vld [vmem:[%s539_s1 + $0x84] ss:$8 sps:$4 sm:$0xff]   ;;  %v375_v19 = vld [vmem:[%s539_s1 + $0x94] ss:$8 sps:$4 sm:$0xff]   ;;  %v377_v20 = vld [vmem:[%s539_s1 + $0x90] ss:$8 sps:$4 sm:$0xff]  }
   0x8   :  { %238 = vmatprep.subr.bf16.mxu0 %v354_v4  ;;  %v378_v21 = vld [vmem:[%s539_s1 + $0xa4] ss:$8 sps:$4 sm:$0xff]   ;;  %v380_v22 = vld [vmem:[%s539_s1 + $0xa0] ss:$8 sps:$4 sm:$0xff]   ;;  %v381_v23 = vld [vmem:[%s539_s1 + $0xb4] ss:$8 sps:$4 sm:$0xff]  }
   0x9   :  { %v383_v24 = vld [vmem:[%s539_s1 + $0xb0] ss:$8 sps:$4 sm:$0xff]   ;;  %v384_v25 = vld [vmem:[%s539_s1 + $0xc4] ss:$8 sps:$4 sm:$0xff]   ;;  %v386_v26 = vld [vmem:[%s539_s1 + $0xc0] ss:$8 sps:$4 sm:$0xff]  }
   0xa   :  { %v387_v27 = vld [vmem:[%s539_s1 + $0xd4] ss:$8 sps:$4 sm:$0xff]   ;;  %v389_v28 = vld [vmem:[%s539_s1 + $0xd0] ss:$8 sps:$4 sm:$0xff]   ;;  %v390_v29 = vld [vmem:[%s539_s1 + $0xe4] ss:$8 sps:$4 sm:$0xff]  }
   0xb   :  { %239 = vmatpush1.bf16.msra.mxu0 %v356_v5  ;;  %v392_v30 = vld [vmem:[%s539_s1 + $0xe0] ss:$8 sps:$4 sm:$0xff]   ;;  %v393_v31 = vld [vmem:[%s539_s1 + $0xf4] ss:$8 sps:$4 sm:$0xff]   ;;  %v395_v32 = vld [vmem:[%s539_s1 + $0xf0] ss:$8 sps:$4 sm:$0xff]  }
   0xc   :  { %240 = vmatprep.subr.bf16.mxu0 %v357_v6  ;;  %v396_v33 = vld [vmem:[%s540_s0] ss:$8 sps:$4 sm:$0xff]   ;;  %v20_v37 = vld [vmem:[%s541_s2 + $0x10] sm:$0xff]  ;;  %v21_v40 = vld [vmem:[%s541_s2 + $0x18] sm:$0xff] }
   0xd   :  { %v18_v34 = vld [vmem:[%s541_s2] sm:$0xff]  ;;  %v19_v35 = vld [vmem:[%s541_s2 + $0x8] sm:$0xff] }
   0xf   :  { %241 = vmatpush1.bf16.msra.mxu0 %v359_v7 }
  0x10   :  { %242 = vmatprep.subr.bf16.mxu0 %v360_v8 }
  0x13   :  { %243 = vmatpush1.bf16.msra.mxu0 %v362_v9 }
  0x14   :  { %244 = vmatprep.subr.bf16.mxu0 %v363_v10 }
  0x17   :  { %245 = vmatpush1.bf16.msra.mxu0 %v365_v11 }
  0x18   :  { %246 = vmatprep.subr.bf16.mxu0 %v366_v12 }
  0x1b   :  { %247 = vmatpush1.bf16.msra.mxu0 %v368_v14 }
  0x1c   :  { %248 = vmatprep.subr.bf16.mxu0 %v369_v15 }
  0x1f   :  { %249 = vmatpush1.bf16.msra.mxu0 %v371_v16 }
  0x20   :  { %250 = vmatprep.subr.bf16.mxu0 %v372_v17 }
  0x23   :  { %251 = vmatpush1.bf16.msra.mxu0 %v374_v18 }
  0x24   :  { %252 = vmatprep.subr.bf16.mxu0 %v375_v19 }
  0x27   :  { %253 = vmatpush1.bf16.msra.mxu0 %v377_v20 }
  0x28   :  { %254 = vmatprep.subr.bf16.mxu0 %v378_v21 }
  0x2b   :  { %255 = vmatpush1.bf16.msra.mxu0 %v380_v22 }
  0x2c   :  { %256 = vmatprep.subr.bf16.mxu0 %v381_v23 }
  0x2f   :  { %257 = vmatpush1.bf16.msra.mxu0 %v383_v24 }
  0x30   :  { %258 = vmatprep.subr.bf16.mxu0 %v384_v25 }
  0x33   :  { %259 = vmatpush1.bf16.msra.mxu0 %v386_v26 }
  0x34   :  { %260 = vmatprep.subr.bf16.mxu0 %v387_v27 }
  0x37   :  { %261 = vmatpush1.bf16.msra.mxu0 %v389_v28 }
  0x38   :  { %262 = vmatprep.subr.bf16.mxu0 %v390_v29 }
  0x3b   :  { %263 = vmatpush1.bf16.msra.mxu0 %v392_v30 }
  0x3c   :  { %264 = vmatprep.subr.bf16.mxu0 %v393_v31 }
  0x3f   :  { %265 = vmatpush1.bf16.msra.mxu0 %v395_v32 }
  0x42   :  { %267 = vmatmul.mubr.bf16.vlgmr.msra.gmra.mrb[0].mxu0 %v396_v33 }
 0x115   :  { %v268_v36 = vpop.f32.mrb[0].mxu0 }
 0x116   :  { %v277_v38 = vadd.f32 %v268_v36, %v18_v34  ;;  %v270_v39 = vpop.f32.mrb[1].mxu0 }
 0x117   :  { %v278_v41 = vadd.f32 %v270_v39, %v19_v35  ;;  %v272_v42 = vpop.f32.mrb[2].mxu0 }
 0x118   :  { %v279_v43 = vadd.f32 %v272_v42, %v20_v37  ;;  %v274_v44 = vpop.f32.mrb[3].mxu0 }
 0x119   :  { %v346_v45 = vpack.c.bf16 %v278_v41, %v277_v38  ;;  %v280_v46 = vadd.f32 %v274_v44, %v21_v40 }
 0x11b   :  { %304 = vst [vmem:[%s542_s3] sm:$0xff] %v346_v45  ;;  %v347_v47 = vpack.c.bf16 %v280_v46, %v279_v43 }
 0x11d   :  { %305 = vst [vmem:[%s542_s3 + $0x8] sm:$0xff] %v347_v47 }

// kernel: data_consistency_sinogram.3
= control target key start
LH: loop header
LB: loop body
LE: loop exit
PB: predicated region body
PF: predicated region fallthrough
CT: control target
= control target key end

     0   :  { %s507_s1 = inlined_call_operand.vmem [shape: bf16[256,256], index: 1, kind: input, shape index: {}]   ;;  %s508_s0 = inlined_call_operand.vmem [shape: bf16[16,256], index: 0, kind: input, shape index: {}]   ;;  %s509_s2 = inlined_call_operand.vmem [shape: f32[16,256], index: 2, kind: output, shape index: {}]  }
   0x1   :  { %v327_v0 = vld [vmem:[%s507_s1 + $0x4] ss:$8 sps:$4 sm:$0xff]   ;;  %v329_v1 = vld [vmem:[%s507_s1] ss:$8 sps:$4 sm:$0xff]   ;;  %v330_v2 = vld [vmem:[%s507_s1 + $0x14] ss:$8 sps:$4 sm:$0xff]  }
   0x2   :  { %227 = vmatprep.subr.bf16.mxu0 %v327_v0  ;;  %v332_v3 = vld [vmem:[%s507_s1 + $0x10] ss:$8 sps:$4 sm:$0xff]   ;;  %v333_v4 = vld [vmem:[%s507_s1 + $0x24] ss:$8 sps:$4 sm:$0xff]   ;;  %v335_v5 = vld [vmem:[%s507_s1 + $0x20] ss:$8 sps:$4 sm:$0xff]  }
   0x3   :  { %228 = vmatpush1.bf16.msra.mxu0 %v329_v1  ;;  %v336_v6 = vld [vmem:[%s507_s1 + $0x34] ss:$8 sps:$4 sm:$0xff]   ;;  %v338_v7 = vld [vmem:[%s507_s1 + $0x30] ss:$8 sps:$4 sm:$0xff]   ;;  %v339_v8 = vld [vmem:[%s507_s1 + $0x44] ss:$8 sps:$4 sm:$0xff]  }
   0x4   :  { %229 = vmatprep.subr.bf16.mxu0 %v330_v2  ;;  %v341_v9 = vld [vmem:[%s507_s1 + $0x40] ss:$8 sps:$4 sm:$0xff]   ;;  %v342_v10 = vld [vmem:[%s507_s1 + $0x54] ss:$8 sps:$4 sm:$0xff]   ;;  %v344_v11 = vld [vmem:[%s507_s1 + $0x50] ss:$8 sps:$4 sm:$0xff]  }
   0x5   :  { %v345_v12 = vld [vmem:[%s507_s1 + $0x64] ss:$8 sps:$4 sm:$0xff]   ;;  %v347_v14 = vld [vmem:[%s507_s1 + $0x60] ss:$8 sps:$4 sm:$0xff]   ;;  %v348_v15 = vld [vmem:[%s507_s1 + $0x74] ss:$8 sps:$4 sm:$0xff]  }
   0x6   :  { %v377_v13 = vld [vmem:[%s508_s0 + $0x4] ss:$8 sps:$4 sm:$0xff]   ;;  %v350_v16 = vld [vmem:[%s507_s1 + $0x70] ss:$8 sps:$4 sm:$0xff]   ;;  %v353_v18 = vld [vmem:[%s507_s1 + $0x80] ss:$8 sps:$4 sm:$0xff]  }
   0x7   :  { %230 = vmatpush1.bf16.msra.mxu0 %v332_v3  ;;  %259 = vmatprep.mubr.bf16.mxu0 %v377_v13  ;;  %v351_v17 = vld [vmem:[%s507_s1 + $0x84] ss:$8 sps:$4 sm:$0xff]   ;;  %v354_v19 = vld [vmem:[%s507_s1 + $0x94] ss:$8 sps:$4 sm:$0xff]   ;;  %v356_v20 = vld [vmem:[%s507_s1 + $0x90] ss:$8 sps:$4 sm:$0xff]  }
   0x8   :  { %231 = vmatprep.subr.bf16.mxu0 %v333_v4  ;;  %v357_v21 = vld [vmem:[%s507_s1 + $0xa4] ss:$8 sps:$4 sm:$0xff]   ;;  %v359_v22 = vld [vmem:[%s507_s1 + $0xa0] ss:$8 sps:$4 sm:$0xff]   ;;  %v360_v23 = vld [vmem:[%s507_s1 + $0xb4] ss:$8 sps:$4 sm:$0xff]  }
   0x9   :  { %v362_v24 = vld [vmem:[%s507_s1 + $0xb0] ss:$8 sps:$4 sm:$0xff]   ;;  %v363_v25 = vld [vmem:[%s507_s1 + $0xc4] ss:$8 sps:$4 sm:$0xff]   ;;  %v365_v26 = vld [vmem:[%s507_s1 + $0xc0] ss:$8 sps:$4 sm:$0xff]  }
   0xa   :  { %v366_v27 = vld [vmem:[%s507_s1 + $0xd4] ss:$8 sps:$4 sm:$0xff]   ;;  %v368_v28 = vld [vmem:[%s507_s1 + $0xd0] ss:$8 sps:$4 sm:$0xff]   ;;  %v369_v29 = vld [vmem:[%s507_s1 + $0xe4] ss:$8 sps:$4 sm:$0xff]  }
   0xb   :  { %232 = vmatpush1.bf16.msra.mxu0 %v335_v5  ;;  %v371_v30 = vld [vmem:[%s507_s1 + $0xe0] ss:$8 sps:$4 sm:$0xff]   ;;  %v372_v31 = vld [vmem:[%s507_s1 + $0xf4] ss:$8 sps:$4 sm:$0xff]   ;;  %v374_v32 = vld [vmem:[%s507_s1 + $0xf0] ss:$8 sps:$4 sm:$0xff]  }
   0xc   :  { %233 = vmatprep.subr.bf16.mxu0 %v336_v6  ;;  %v375_v33 = vld [vmem:[%s508_s0] ss:$8 sps:$4 sm:$0xff]  }
   0xf   :  { %234 = vmatpush1.bf16.msra.mxu0 %v338_v7 }
  0x10   :  { %235 = vmatprep.subr.bf16.mxu0 %v339_v8 }
  0x13   :  { %236 = vmatpush1.bf16.msra.mxu0 %v341_v9 }
  0x14   :  { %237 = vmatprep.subr.bf16.mxu0 %v342_v10 }
  0x17   :  { %238 = vmatpush1.bf16.msra.mxu0 %v344_v11 }
  0x18   :  { %239 = vmatprep.subr.bf16.mxu0 %v345_v12 }
  0x1b   :  { %240 = vmatpush1.bf16.msra.mxu0 %v347_v14 }
  0x1c   :  { %241 = vmatprep.subr.bf16.mxu0 %v348_v15 }
  0x1f   :  { %242 = vmatpush1.bf16.msra.mxu0 %v350_v16 }
  0x20   :  { %243 = vmatprep.subr.bf16.mxu0 %v351_v17 }
  0x23   :  { %244 = vmatpush1.bf16.msra.mxu0 %v353_v18 }
  0x24   :  { %245 = vmatprep.subr.bf16.mxu0 %v354_v19 }
  0x27   :  { %246 = vmatpush1.bf16.msra.mxu0 %v356_v20 }
  0x28   :  { %247 = vmatprep.subr.bf16.mxu0 %v357_v21 }
  0x2b   :  { %248 = vmatpush1.bf16.msra.mxu0 %v359_v22 }
  0x2c   :  { %249 = vmatprep.subr.bf16.mxu0 %v360_v23 }
  0x2f   :  { %250 = vmatpush1.bf16.msra.mxu0 %v362_v24 }
  0x30   :  { %251 = vmatprep.subr.bf16.mxu0 %v363_v25 }
  0x33   :  { %252 = vmatpush1.bf16.msra.mxu0 %v365_v26 }
  0x34   :  { %253 = vmatprep.subr.bf16.mxu0 %v366_v27 }
  0x37   :  { %254 = vmatpush1.bf16.msra.mxu0 %v368_v28 }
  0x38   :  { %255 = vmatprep.subr.bf16.mxu0 %v369_v29 }
  0x3b   :  { %256 = vmatpush1.bf16.msra.mxu0 %v371_v30 }
  0x3c   :  { %257 = vmatprep.subr.bf16.mxu0 %v372_v31 }
  0x3f   :  { %258 = vmatpush1.bf16.msra.mxu0 %v374_v32 }
  0x42   :  { %260 = vmatmul.mubr.bf16.vlgmr.msra.gmra.mrb[0].mxu0 %v375_v33 }
 0x115   :  { %v261_v34 = vpop.f32.mrb[0].mxu0 }
 0x116   :  { %285 = vst [vmem:[%s509_s2] sm:$0xff] %v261_v34  ;;  %v263_v35 = vpop.f32.mrb[1].mxu0 }
 0x117   :  { %286 = vst [vmem:[%s509_s2 + $0x8] sm:$0xff] %v263_v35  ;;  %v265_v36 = vpop.f32.mrb[2].mxu0 }
 0x118   :  { %287 = vst [vmem:[%s509_s2 + $0x10] sm:$0xff] %v265_v36  ;;  %v267_v37 = vpop.f32.mrb[3].mxu0 }
 0x119   :  { %288 = vst [vmem:[%s509_s2 + $0x18] sm:$0xff] %v267_v37 }

</bundles_post_ra>
